<compile_context>
chip_gen: v7x
topology: tpu7x:2x2x1
jax: 0.10.0
libtpu: 0.0.40
codegen_flags: <defaults>
</compile_context>

<pallas_src>
from functools import partial

import jax
import jax.numpy as jnp
from jax import lax
from jax.experimental import pallas as pl
from jax.experimental.pallas import tpu as pltpu

# ---- synthetic "text encoder" dimensions (real CLIP: V=49408+, D=768, S=77) --
V = 256          # vocab size (incl. placeholder tokens appended at the end)
D = 128          # hidden size
S = 16           # max sequence length
ENCODERS_NUM_ID_VECS = (4, 4)                    # one entry per adaface encoder
N_PLACEHOLDER = sum(ENCODERS_NUM_ID_VECS)        # tokens added by extend_tokenizer
PLACEHOLDER_TOKEN_IDS = tuple(range(V - N_PLACEHOLDER, V))   # contiguous tail
PAD_TOKEN_ID = 0
COMMA_TOKEN_ID = 5                               # stands in for the ', ' null token

HALF = jnp.bfloat16   # TPU analogue of torch.float16 used by the pipeline

_SMEM = pl.BlockSpec(memory_space=pltpu.MemorySpace.SMEM)
_VMEM = pl.BlockSpec(memory_space=pltpu.MemorySpace.VMEM)
_ANY = pl.BlockSpec(memory_space=pl.ANY)


# ----------------------------------------------------------------------------
# Kernel 1: update_text_encoder_subj_embeddings
#   token_embeds[placeholder_token_ids] = subj_embs
#   Placeholder ids are the contiguous tail of the table, so this is a pure
#   in-place write of the last N_PLACEHOLDER rows: the table input is aliased
#   to the output and only the tail block is covered by out_specs / written
#   back; all other rows never move HBM<->VMEM.
# ----------------------------------------------------------------------------
def _scatter_tail_kernel(subj_ref, table_ref, out_ref):
    del table_ref   # aliased to the output; present only to establish the alias
    out_ref[...] = subj_ref[...].astype(out_ref.dtype)


def update_token_table(table, subj_embs):
    v, d = table.shape
    n = subj_embs.shape[0]
    # tail block must be (8,128)-aligned and sit exactly on a block boundary
    assert n % 8 == 0 and v % n == 0 and d % 128 == 0
    return pl.pallas_call(
        _scatter_tail_kernel,
        out_shape=jax.ShapeDtypeStruct((v, d), table.dtype),
        grid=(1,),
        in_specs=[
            pl.BlockSpec((n, d), lambda i: (0, 0)),          # subject embeddings
            _ANY,                                            # table (HBM, aliased)
        ],
        out_specs=pl.BlockSpec((n, d), lambda i: (v // n - 1, 0)),  # tail rows only
        input_output_aliases={1: 0},
    )(subj_embs, table)


# ----------------------------------------------------------------------------
# Kernel 2: fused text-encoder hot path (prompt + negative [+ null-negative])
#   rows  = gather(table, ids)          -- per-row DMA from HBM-resident table
#   x     = layer_norm(rows + pos)      -- f32 statistics
#   enc   = x @ W + b                   -- single (P*S, D) bf16 MXU matmul
#   out[0]= enc[prompt]
#   out[1]= w*enc[neg] + (1-w)*enc[null_neg]   (or enc[neg] when not blending)
# ----------------------------------------------------------------------------
def _fused_encode_kernel(ids_ref, wblend_ref, table_hbm, pos_ref, wout_ref, b_ref,
                         out_ref, rows, sems, *, num_prompts, seq_len, blend):
    n_rows = num_prompts * seq_len

    # -- 1. true row gather: DMA only the needed table rows into VMEM ---------
    for p in range(num_prompts):
        for s in range(seq_len):
            r = p * seq_len + s
            tok = ids_ref[p, s]                               # SMEM scalar read
            pltpu.make_async_copy(
                table_hbm.at[pl.ds(tok, 1), :],
                rows.at[pl.ds(r, 1), :],
                sems.at[r],
            ).start()
    for r in range(n_rows):
        pltpu.make_async_copy(
            table_hbm.at[pl.ds(0, 1), :],                     # shape-only for wait
            rows.at[pl.ds(r, 1), :],
            sems.at[r],
        ).wait()

    # -- 2. positional embedding + layer norm (stats in f32) ------------------
    pos = pos_ref[...].astype(jnp.float32)                    # (S, D)
    x = rows[...] + jnp.concatenate([pos] * num_prompts, axis=0)   # (P*S, D) f32
    mean = jnp.mean(x, axis=-1, keepdims=True)
    xc = x - mean
    var = jnp.mean(xc * xc, axis=-1, keepdims=True)
    xn = (xc * lax.rsqrt(var + 1e-5)).astype(wout_ref.dtype)  # bf16 operands -> MXU

    # -- 3. output projection: one (P*S, D) @ (D, D) bf16 matmul --------------
    enc = jnp.dot(xn, wout_ref[...], preferred_element_type=jnp.float32)
    enc = enc + b_ref[...].astype(jnp.float32)                # (P*S, D) f32

    # -- 4. split / blend epilogue --------------------------------------------
    prompt_e = enc[0:seq_len]
    neg_e = enc[seq_len:2 * seq_len]
    if blend:                                   # static: 0 < weight < 1
        w = wblend_ref[0]                       # runtime data (SMEM), no recompile
        null_e = enc[2 * seq_len:3 * seq_len]
        neg_e = w * neg_e + (1.0 - w) * null_e
    out_ref[0] = prompt_e.astype(out_ref.dtype)
    out_ref[1] = neg_e.astype(out_ref.dtype)


def fused_text_encode(ids, blend_weight, table, pos_emb, w_out, b_out, *, blend):
    num_prompts, seq_len = ids.shape
    d = table.shape[1]
    kernel = partial(_fused_encode_kernel, num_prompts=num_prompts,
                     seq_len=seq_len, blend=blend)
    return pl.pallas_call(
        kernel,
        out_shape=jax.ShapeDtypeStruct((2, seq_len, d), HALF),
        in_specs=[
            _SMEM,   # token ids (P, S) int32
            _SMEM,   # blend weight (1,) f32
            _ANY,    # embedding table stays in HBM; rows are DMA-gathered
            _VMEM,   # positional embedding (S, D)
            _VMEM,   # output projection W (D, D)
            _VMEM,   # output projection b (1, D)
        ],
        out_specs=_VMEM,
        scratch_shapes=[
            pltpu.VMEM((num_prompts * seq_len, d), jnp.float32),   # gathered rows
            pltpu.SemaphoreType.DMA((num_prompts * seq_len,)),     # per-row DMA sems
        ],
    )(ids, blend_weight, table, pos_emb, w_out, b_out)


# ----------------------------------------------------------------------------
# AdaFaceWrapper (JAX / Pallas version)
# ----------------------------------------------------------------------------
class AdaFaceWrapperPallas:
    def __init__(self, key):
        k_tab, k_pos, k_w, k_b, k_subj = jax.random.split(key, 5)
        # Synthetic deterministic "checkpoint" for the (extended) text encoder.
        # The token table is kept f32 so each gathered row is one full,
        # sublane-aligned 512-byte DMA; projection weights are kept in the
        # pipeline's half precision and feed the MXU as bf16.
        self.token_table_init = jax.random.normal(k_tab, (V, D), jnp.float32) * 0.02
        self.pos_emb = (jax.random.normal(k_pos, (S, D), jnp.float32) * 0.01
                        ).astype(HALF)
        self.w_out = (jax.random.normal(k_w, (D, D), jnp.float32)
                      / jnp.sqrt(D)).astype(HALF)
        self.b_out = (jax.random.normal(k_b, (1, D), jnp.float32) * 0.01
                      ).astype(HALF)
        # tokenizer.add_tokens appends, so the placeholder ids are the table tail
        self.placeholder_token_ids = PLACEHOLDER_TOKEN_IDS
        assert self.placeholder_token_ids == tuple(range(V - N_PLACEHOLDER, V))
        # Synthetic adaface subject embeddings (id2ada_prompt_encoder output).
        self.subj_embs = jax.random.normal(k_subj, (N_PLACEHOLDER, D),
                                           jnp.float32) * 0.02
        # prepare_adaface_embeddings -> update_text_encoder_subj_embeddings
        self.token_table = update_token_table(self.token_table_init,
                                              self.subj_embs)

    # token-id level analogue of update_prompt (regex/tokenizer is glue).
    def _update_prompt_ids(self, base_ids, pos='append', use_null=False):
        ph = ([COMMA_TOKEN_ID] * N_PLACEHOLDER if use_null
              else list(PLACEHOLDER_TOKEN_IDS))
        ids = (ph + list(base_ids)) if pos == 'prepend' else (list(base_ids) + ph)
        ids = ids[:S] + [PAD_TOKEN_ID] * (S - len(ids))
        return jnp.asarray(ids, jnp.int32)

    def encode_prompt(self, prompt_ids, negative_prompt_ids,
                      placeholder_tokens_pos='append', do_neg_id_prompt_weight=0.0):
        p_ids = self._update_prompt_ids(prompt_ids, pos=placeholder_tokens_pos)
        if do_neg_id_prompt_weight > 0:
            n_ids = self._update_prompt_ids(negative_prompt_ids, pos='prepend')
        else:
            # torch path: negative prompt is used as-is (no placeholder tokens)
            base = list(negative_prompt_ids)[:S]
            n_ids = jnp.asarray(base + [PAD_TOKEN_ID] * (S - len(base)), jnp.int32)

        blend = 0.0 < do_neg_id_prompt_weight < 1.0
        id_rows = [p_ids, n_ids]
        if blend:
            id_rows.append(self._update_prompt_ids(
                negative_prompt_ids, pos='prepend', use_null=True))
        ids = jnp.stack(id_rows)                                   # (P, S) int32
        w_blend = jnp.asarray([do_neg_id_prompt_weight], jnp.float32)

        out = fused_text_encode(ids, w_blend, self.token_table, self.pos_emb,
                                self.w_out, self.b_out, blend=blend)
        return out[0], out[1]           # prompt_embeds, negative_prompt_embeds

    def forward(self, noise, prompt_ids, negative_prompt_ids,
                placeholder_tokens_pos='append', do_neg_id_prompt_weight=0.0,
                guidance_scale=6.0, out_image_count=4, ref_img_strength=0.8):
        noise = noise.astype(HALF)  # noise.to(device, dtype=torch.float16)
        prompt_embeds, negative_prompt_embeds = self.encode_prompt(
            prompt_ids, negative_prompt_ids,
            placeholder_tokens_pos=placeholder_tokens_pos,
            do_neg_id_prompt_weight=do_neg_id_prompt_weight)
        # .repeat(out_image_count, 1, 1): plain broadcast copy, done by XLA.
        prompt_embeds = jnp.tile(prompt_embeds[None], (out_image_count, 1, 1))
        negative_prompt_embeds = jnp.tile(negative_prompt_embeds[None],
                                          (out_image_count, 1, 1))
        # TODO(synk): the diffusers StableDiffusion pipeline call (DDIM
        # scheduler loop, UNet denoising with CFG, VAE decode -> images) has no
        # clean Pallas equivalent here; we return the conditioned embeddings.
        return prompt_embeds, negative_prompt_embeds, noise


if __name__ == "__main__":
    key = jax.random.PRNGKey(0)
    k_model, k_noise = jax.random.split(key)

    wrapper = AdaFaceWrapperPallas(k_model)

    # in-place tail scatter: new rows match subj_embs, other rows untouched
    assert bool(jnp.array_equal(wrapper.token_table[V - N_PLACEHOLDER:],
                                wrapper.subj_embs))
    assert bool(jnp.array_equal(wrapper.token_table[:V - N_PLACEHOLDER],
                                wrapper.token_table_init[:V - N_PLACEHOLDER]))

    # img2img-style latent noise, PyTorch NCHW layout: (out_image_count, C, H, W)
    noise = jax.random.normal(k_noise, (4, 4, 16, 16), jnp.float32)

    # pre-tokenized synthetic prompt / negative prompt (tokenizer is glue).
    prompt_ids = [3, 17, 42, 9]
    negative_prompt_ids = [7, 11, 23, 2, 30]

    prompt_embeds, negative_prompt_embeds, noise_out = wrapper.forward(
        noise, prompt_ids, negative_prompt_ids,
        placeholder_tokens_pos='append',
        do_neg_id_prompt_weight=0.5,
        guidance_scale=6.0,
        out_image_count=4)

    jax.block_until_ready((prompt_embeds, negative_prompt_embeds, noise_out))
    assert prompt_embeds.shape == (4, S, D) and prompt_embeds.dtype == HALF
    assert negative_prompt_embeds.shape == (4, S, D)
    assert noise_out.dtype == HALF
    print("KERNEL_OK")
</pallas_src>

<mosaic_0001>
module attributes {stable_mosaic.version = 11 : i64} {
  func.func @_scatter_tail_kernel(%arg0: i32, %arg1: memref<8x128xf32, #tpu.memory_space<vmem>>, %arg2: memref<256x128xf32, #tpu.memory_space<any>>, %arg3: memref<8x128xf32, #tpu.memory_space<vmem>>) attributes {dimension_semantics = [#tpu.dimension_semantics<arbitrary>], iteration_bounds = array<i64: 1>, scalar_prefetch = 0 : i64, scratch_operands = 0 : i64, tpu.core_type = #tpu.core_type<tc>, window_params = [{pipeline_mode = #tpu.pipeline_mode<synchronous>, transform_indices = @transform_0, window_bounds = array<i64: 8, 128>}, {}, {transform_indices = @transform_2, window_bounds = array<i64: 8, 128>}]} {
    %c0 = arith.constant 0 : index
    %c0_0 = arith.constant 0 : index
    %0 = vector.load %arg1[%c0, %c0_0] : memref<8x128xf32, #tpu.memory_space<vmem>>, vector<8x128xf32>
    %c0_1 = arith.constant 0 : index
    %c0_2 = arith.constant 0 : index
    %1 = vector.load %arg3[%c0_1, %c0_2] : memref<8x128xf32, #tpu.memory_space<vmem>>, vector<8x128xf32>
    tpu.vector_store %arg3[%c0_1, %c0_2], %0 {strides = array<i32>} : memref<8x128xf32, #tpu.memory_space<vmem>>, vector<8x128xf32>,
    return
  }
  func.func @transform_0(%arg0: i32) -> (i32, i32) {
    %c0_i32 = arith.constant 0 : i32
    %c0_i32_0 = arith.constant 0 : i32
    %c0_i32_1 = arith.constant 0 : i32
    return %c0_i32, %c0_i32_0 : i32, i32
  }
  func.func @transform_2(%arg0: i32) -> (i32, i32) {
    %c31_i32 = arith.constant 31 : i32
    %c0_i32 = arith.constant 0 : i32
    %c0_i32_0 = arith.constant 0 : i32
    return %c31_i32, %c0_i32 : i32, i32
  }
}

</mosaic_0001>

<bundles_post_ra>
// kernel: tpu_custom_call.1
= control target key start
LH: loop header
LB: loop body
LE: loop exit
PB: predicated region body
PF: predicated region fallthrough
CT: control target
= control target key end

     0   :  { %s83_s0 = inlined_call_operand.vmem [shape: f32[8,128], index: 0, kind: input, shape index: {}]   ;;  %s84_s1 = inlined_call_operand.hbm [shape: f32[256,128], index: 1, kind: input, shape index: {}, may-alias: {1,2}]   ;;  %s85_s2 = inlined_call_operand.hbm [shape: f32[256,128], index: 2, kind: output, shape index: {}, may-alias: {1,2}]  }
   0x1   :  { %v10_v0 = vld [vmem:[%s83_s0] sm:$0xff] }
   0x2   :  { %7 = vsyncpa [#allocation3], 0  ;;  %s17_s13 = scalar_lea.hbm %s85_s2, 3968  ;;  %11 = vst [vmem:[#allocation2] sm:$0xff] %v10_v0  ;;  %s55_s14 = smov [#allocation2]  }
   0x3   :  { %s19_s15 = sshll.u32 %s55_s14, 4  ;;  %s20_s15 = int_to_ptr.vmem [resolvable:$true] %s19_s15 }
   0x4   :  { %s28_s16 = scalar_lea.vmem %s20_s15, 128  ;;  %p33_p1 = scmp.lt.s32.totalorder %s20_s15, %s20_s15 }
   0x5   :  { %p29_p0 = scmp.ne.s32.totalorder %s20_s15, %s28_s16  ;;  %p34_p2 = scmp.lt.s32.totalorder %s28_s16, %s28_s16 }
   0x7   :  { %p35_p3 = por %p34_p2, %p33_p1 }
   0x9   :  { %p36_p4 = pnand %p35_p3, %p29_p0 }
   0xb   :  { %39 = shalt.err (!%p36_p4)
}
   0xc   :  { %s52_s0 = scalar_lea.hbm %s85_s2, 4096  ;;  %p43_p6 = scmp.lt.u32.totalorder %s17_s13, %s85_s2 }
   0xd   :  { %p41_p5 = scmp.ne.s32.totalorder %s17_s13, %s52_s0  ;;  %p44_p7 = scmp.lt.u32.totalorder %s52_s0, %s52_s0 }
   0xe   :  { %p46_p9 = scmp.lt.u32.totalorder %s52_s0, %s17_s13 }
   0xf   :  { %p45_p8 = por %p44_p7, %p43_p6 }
  0x11   :  { %p47_p10 = por %p46_p9, %p45_p8 }
  0x13   :  { %p48_p11 = pnand %p47_p10, %p41_p5 }
  0x15   :  { %51 = shalt.err (!%p48_p11)
}
  0x16   :  { %22 = dma.vmem_to_hbm [thread:$0]  %s20_s15, 128, %s17_s13, [#allocation3]  }
  0x17   :  { %53 = dma.done.wait [#allocation3], 128  }
  0x18   :  { %54 = vsyncadd [#allocation3], 4294967168 }
  0x19   :  { %26 = vsyncpa [#allocation3], 1 }

</bundles_post_ra>
